<compile_context>
chip_gen: v7x
topology: tpu7x:2x2x1
jax: 0.10.0
libtpu: 0.0.40
codegen_flags: <defaults>
</compile_context>

<pallas_src>
import jax
import jax.numpy as jnp
from jax import lax
from jax.experimental import pallas as pl
from jax.experimental.pallas import tpu as pltpu


LANES = 128                      # lane width: last dim of every tile
TM_MAX = 8192                    # rows per grid step -> 4 MiB per f32 input tile
NUM_SLOTS = 2                    # leading "parallel" axis (one slot per TC on v7x)
VMEM_LIMIT_BYTES = 32 * 1024 * 1024


def _round_up(v: int, m: int) -> int:
    return ((v + m - 1) // m) * m


def _make_kernel(tm: int, per_slot: int, n_blocks: int, r_rows: int,
                 need_mask: bool):
    """Kernel for row tile `tm`, `per_slot` blocks per parallel slot."""
    n_chunks = tm // 8           # one (8, 128) vreg pair per inner step

    def kernel(shift_ref, x_ref, y_ref, out_ref):
        c = pl.program_id(0)     # parallel slot (TensorCore on v7x)
        i = pl.program_id(1)     # row-block sweep (reduction axis)

        @pl.when(i == 0)
        def _init():
            out_ref[...] = jnp.zeros_like(out_ref)

        # Shift by (x[0], y[0]); cov/var are shift-invariant, this only
        # improves conditioning of the one-pass moments.  Broadcast hoisted
        # out of the loop (JAX does not CSE broadcast_in_dim).
        sx = jnp.full((8, LANES), shift_ref[0], dtype=jnp.float32)
        sy = jnp.full((8, LANES), shift_ref[1], dtype=jnp.float32)

        zero = jnp.zeros((8, LANES), jnp.float32)
        if need_mask:
            # Valid rows of this *nominal* block: local_row < limit.  Fully
            # out-of-range blocks (index_map clamps them) get limit <= 0 and
            # contribute exactly zero to every moment.
            base = (c * per_slot + i) * tm
            limit = r_rows - base
            row_iota = lax.broadcasted_iota(jnp.int32, (8, LANES), 0)

        def body(k, carry):
            px, py, pxx, pyy, pxy = carry
            roff = pl.multiple_of(k * 8, 8)
            xs = x_ref[pl.ds(roff, 8), :].astype(jnp.float32) - sx
            ys = y_ref[pl.ds(roff, 8), :].astype(jnp.float32) - sy
            if need_mask:
                m = row_iota < (limit - k * 8)
                xs = jnp.where(m, xs, 0.0)
                ys = jnp.where(m, ys, 0.0)
            return (px + xs,
                    py + ys,
                    pxx + xs * xs,
                    pyy + ys * ys,
                    pxy + xs * ys)

        px, py, pxx, pyy, pxy = lax.fori_loop(
            0, n_chunks, body, (zero, zero, zero, zero, zero),
            unroll=min(8, n_chunks))

        # One fused accumulator update per grid step; the output block IS the
        # accumulator (resident across the "arbitrary" axis for a fixed slot).
        out_ref[0, 0] += px
        out_ref[0, 1] += py
        out_ref[0, 2] += pxx
        out_ref[0, 3] += pyy
        out_ref[0, 4] += pxy

    return kernel


def pearson_loss(x, y):
    """|1 - pearson_corr(x, y)| computed with a Pallas TPU kernel.

    x, y: 1-D arrays of equal length N (N must be a multiple of 128).
    Returns a float32 scalar.
    """
    assert x.ndim == 1 and y.ndim == 1 and x.shape == y.shape
    n = x.shape[0]
    # TODO(synk): support N not a multiple of 128 with an additional lane mask
    # on the final row instead of a wrapper-side pad.
    assert n % LANES == 0, "N must be a multiple of 128 for this kernel"

    r = n // LANES
    x2 = x.reshape(r, LANES)       # view-like reshape: no padded HBM copies
    y2 = y.reshape(r, LANES)

    # Row tile: split roughly evenly across the NUM_SLOTS parallel slots and
    # cap at TM_MAX (4 MiB per f32 tile, 16 MiB with double-buffered inputs).
    tm = min(TM_MAX, max(8, _round_up(pl.cdiv(r, NUM_SLOTS), 8)))
    n_blocks = pl.cdiv(r, tm)
    per_slot = pl.cdiv(n_blocks, NUM_SLOTS)
    # Mask only needed when the nominal coverage (NUM_SLOTS*per_slot*tm rows)
    # exceeds the true row count r.
    need_mask = not (r % tm == 0 and n_blocks % NUM_SLOTS == 0)

    # Shift scalars (x[0], y[0]) go to SMEM via scalar prefetch.
    shift = jnp.stack([x2[0, 0], y2[0, 0]]).astype(jnp.float32)

    def in_map(c, i, _shift):
        # Clamp so a fully-masked trailing step never DMAs out of bounds.
        return (jnp.minimum(c * per_slot + i, n_blocks - 1), 0)

    parts = pl.pallas_call(
        _make_kernel(tm, per_slot, n_blocks, r, need_mask),
        out_shape=jax.ShapeDtypeStruct((NUM_SLOTS, 5, 8, LANES), jnp.float32),
        grid_spec=pltpu.PrefetchScalarGridSpec(
            num_scalar_prefetch=1,
            grid=(NUM_SLOTS, per_slot),
            in_specs=[
                pl.BlockSpec((tm, LANES), in_map),
                pl.BlockSpec((tm, LANES), in_map),
            ],
            out_specs=pl.BlockSpec((1, 5, 8, LANES),
                                   lambda c, i, _shift: (c, 0, 0, 0)),
        ),
        compiler_params=pltpu.CompilerParams(
            dimension_semantics=("parallel", "arbitrary"),
            vmem_limit_bytes=VMEM_LIMIT_BYTES,
        ),
        cost_estimate=pl.CostEstimate(
            flops=10 * n,
            transcendentals=0,
            bytes_accessed=2 * n * 4 + NUM_SLOTS * 5 * 8 * LANES * 4,
        ),
    )(shift, x2, y2)

    # Tiny epilogue in JAX: reduce per-slot partial moments -> scalar loss.
    s = jnp.sum(parts, axis=(0, 2, 3))            # (5,) moments of shifted data
    inv_n = jnp.float32(1.0 / n)
    mx = s[0] * inv_n
    my = s[1] * inv_n
    cov = s[4] * inv_n - mx * my
    vx = s[2] * inv_n - mx * mx
    vy = s[3] * inv_n - my * my
    # rsqrt(vx)*rsqrt(vy) avoids overflow of vx*vy; NaN/inf for (near-)constant
    # inputs, matching torch.corrcoef.
    pearson = cov * lax.rsqrt(vx) * lax.rsqrt(vy)
    return jnp.abs(jnp.float32(1.0) - pearson)


if __name__ == "__main__":
    key = jax.random.PRNGKey(0)

    def make_pair(k, n):
        kx, kn = jax.random.split(k)
        x = jax.random.normal(kx, (n,), dtype=jnp.float32) + 3.0
        y = 0.8 * x + 0.3 * jax.random.normal(kn, (n,), dtype=jnp.float32)
        return x, y

    def ref_loss(x, y):
        return jnp.abs(1.0 - jnp.corrcoef(jnp.stack((x, y)))[0, 1])

    # Small shapes consistent with the module's 1-D inputs.
    #   1024: single block, odd block count -> masked duplicate slot
    #   2560: ragged tail (r % tm != 0) -> in-kernel tail mask, no jnp.pad
    #   4096: evenly split, mask-free fast path
    for n in (1024, 2560, 4096):
        key, sub = jax.random.split(key)
        x, y = make_pair(sub, n)
        out = jax.block_until_ready(pearson_loss(x, y))
        ref = ref_loss(x, y)
        assert jnp.allclose(out, ref, rtol=1e-4, atol=1e-5), (n, out, ref)

    print("KERNEL_OK")
</pallas_src>

<mosaic_0001>
module attributes {stable_mosaic.version = 11 : i64} {
  func.func @kernel(%arg0: i32, %arg1: i32, %arg2: memref<2xf32, #tpu.memory_space<smem>>, %arg3: memref<8x128xf32, #tpu.memory_space<vmem>>, %arg4: memref<8x128xf32, #tpu.memory_space<vmem>>, %arg5: memref<1x5x8x128xf32, #tpu.memory_space<vmem>>) attributes {dimension_semantics = [#tpu.dimension_semantics<parallel>, #tpu.dimension_semantics<arbitrary>], iteration_bounds = array<i64: 2, 1>, scalar_prefetch = 1 : i64, scratch_operands = 0 : i64, tpu.core_type = #tpu.core_type<tc>, window_params = [{transform_indices = @transform_0, window_bounds = array<i64: 8, 128>}, {transform_indices = @transform_1, window_bounds = array<i64: 8, 128>}, {transform_indices = @transform_2, window_bounds = array<i64: 1, 5, 8, 128>}]} {
    %c0_i32 = arith.constant 0 : i32
    %0 = arith.cmpi eq, %arg1, %c0_i32 : i32
    %1 = arith.extui %0 : i1 to i32
    %c0_i32_0 = arith.constant 0 : i32
    %2 = arith.cmpi ne, %1, %c0_i32_0 : i32
    scf.if %2 {
      %cst_47 = arith.constant 0.000000e+00 : f32
      %67 = vector.broadcast %cst_47 : f32 to vector<1x5x8x128xf32>
      %c0_48 = arith.constant 0 : index
      %c0_49 = arith.constant 0 : index
      %c0_50 = arith.constant 0 : index
      %c0_51 = arith.constant 0 : index
      %68 = vector.load %arg5[%c0_48, %c0_49, %c0_50, %c0_51] : memref<1x5x8x128xf32, #tpu.memory_space<vmem>>, vector<1x5x8x128xf32>
      tpu.vector_store %arg5[%c0_48, %c0_49, %c0_50, %c0_51], %67 {strides = array<i32>} : memref<1x5x8x128xf32, #tpu.memory_space<vmem>>, vector<1x5x8x128xf32>,
    } else {
    }
    %c0 = arith.constant 0 : index
    %3 = memref.load %arg2[%c0] : memref<2xf32, #tpu.memory_space<smem>>
    %4 = vector.broadcast %3 : f32 to vector<8x128xf32>
    %c1 = arith.constant 1 : index
    %5 = memref.load %arg2[%c1] : memref<2xf32, #tpu.memory_space<smem>>
    %6 = vector.broadcast %5 : f32 to vector<8x128xf32>
    %cst = arith.constant 0.000000e+00 : f32
    %7 = vector.broadcast %cst : f32 to vector<8x128xf32>
    %c1_i32 = arith.constant 1 : i32
    %8 = arith.muli %arg0, %c1_i32 : i32
    %9 = arith.addi %8, %arg1 : i32
    %c8_i32 = arith.constant 8 : i32
    %10 = arith.muli %9, %c8_i32 : i32
    %c8_i32_1 = arith.constant 8 : i32
    %11 = arith.subi %c8_i32_1, %10 : i32
    %12 = tpu.iota {dimensions = array<i32: 0>} : vector<8x128xi32>
    %c0_i32_2 = arith.constant 0 : i32
    %c8_i32_3 = arith.constant 8 : i32
    %13 = arith.muli %c0_i32_2, %c8_i32_3 : i32
    %14 = tpu.assume_multiple %13, 8 : i32
    %15 = arith.index_cast %14 : i32 to index
    %c0_4 = arith.constant 0 : index
    %16 = vector.load %arg3[%15, %c0_4] : memref<8x128xf32, #tpu.memory_space<vmem>>, vector<8x128xf32>
    %17 = arith.subf %16, %4 : vector<8x128xf32>
    %18 = arith.index_cast %14 : i32 to index
    %c0_5 = arith.constant 0 : index
    %19 = vector.load %arg4[%18, %c0_5] : memref<8x128xf32, #tpu.memory_space<vmem>>, vector<8x128xf32>
    %20 = arith.subf %19, %6 : vector<8x128xf32>
    %c8_i32_6 = arith.constant 8 : i32
    %21 = arith.muli %c0_i32_2, %c8_i32_6 : i32
    %22 = arith.subi %11, %21 : i32
    %23 = vector.broadcast %22 : i32 to vector<8x128xi32>
    %24 = arith.cmpi slt, %12, %23 : vector<8x128xi32>
    %cst_7 = arith.constant 0.000000e+00 : f32
    %25 = vector.broadcast %cst_7 : f32 to vector<8x128xf32>
    %26 = arith.select %24, %17, %25 : vector<8x128xi1>, vector<8x128xf32>
    %cst_8 = arith.constant 0.000000e+00 : f32
    %27 = vector.broadcast %cst_8 : f32 to vector<8x128xf32>
    %28 = arith.select %24, %20, %27 : vector<8x128xi1>, vector<8x128xf32>
    %29 = arith.addf %7, %26 : vector<8x128xf32>
    %30 = arith.addf %7, %28 : vector<8x128xf32>
    %31 = arith.mulf %26, %26 : vector<8x128xf32>
    %32 = arith.addf %7, %31 : vector<8x128xf32>
    %33 = arith.mulf %28, %28 : vector<8x128xf32>
    %34 = arith.addf %7, %33 : vector<8x128xf32>
    %35 = arith.mulf %26, %28 : vector<8x128xf32>
    %36 = arith.addf %7, %35 : vector<8x128xf32>
    %c1_i32_9 = arith.constant 1 : i32
    %c0_10 = arith.constant 0 : index
    %c0_11 = arith.constant 0 : index
    %c0_12 = arith.constant 0 : index
    %c0_13 = arith.constant 0 : index
    %37 = vector.load %arg5[%c0_10, %c0_11, %c0_12, %c0_13] : memref<1x5x8x128xf32, #tpu.memory_space<vmem>>, vector<1x1x8x128xf32>
    %38 = vector.shape_cast %37 : vector<1x1x8x128xf32> to vector<8x128xf32>
    %39 = arith.addf %38, %29 : vector<8x128xf32>
    %c0_14 = arith.constant 0 : index
    %c0_15 = arith.constant 0 : index
    %c0_16 = arith.constant 0 : index
    %c0_17 = arith.constant 0 : index
    %40 = vector.load %arg5[%c0_14, %c0_15, %c0_16, %c0_17] : memref<1x5x8x128xf32, #tpu.memory_space<vmem>>, vector<1x1x8x128xf32>
    %41 = vector.shape_cast %40 : vector<1x1x8x128xf32> to vector<8x128xf32>
    %42 = vector.shape_cast %39 : vector<8x128xf32> to vector<1x1x8x128xf32>
    tpu.vector_store %arg5[%c0_14, %c0_15, %c0_16, %c0_17], %42 {strides = array<i32>} : memref<1x5x8x128xf32, #tpu.memory_space<vmem>>, vector<1x1x8x128xf32>,
    %c0_18 = arith.constant 0 : index
    %c1_19 = arith.constant 1 : index
    %c0_20 = arith.constant 0 : index
    %c0_21 = arith.constant 0 : index
    %43 = vector.load %arg5[%c0_18, %c1_19, %c0_20, %c0_21] : memref<1x5x8x128xf32, #tpu.memory_space<vmem>>, vector<1x1x8x128xf32>
    %44 = vector.shape_cast %43 : vector<1x1x8x128xf32> to vector<8x128xf32>
    %45 = arith.addf %44, %30 : vector<8x128xf32>
    %c0_22 = arith.constant 0 : index
    %c1_23 = arith.constant 1 : index
    %c0_24 = arith.constant 0 : index
    %c0_25 = arith.constant 0 : index
    %46 = vector.load %arg5[%c0_22, %c1_23, %c0_24, %c0_25] : memref<1x5x8x128xf32, #tpu.memory_space<vmem>>, vector<1x1x8x128xf32>
    %47 = vector.shape_cast %46 : vector<1x1x8x128xf32> to vector<8x128xf32>
    %48 = vector.shape_cast %45 : vector<8x128xf32> to vector<1x1x8x128xf32>
    tpu.vector_store %arg5[%c0_22, %c1_23, %c0_24, %c0_25], %48 {strides = array<i32>} : memref<1x5x8x128xf32, #tpu.memory_space<vmem>>, vector<1x1x8x128xf32>,
    %c0_26 = arith.constant 0 : index
    %c2 = arith.constant 2 : index
    %c0_27 = arith.constant 0 : index
    %c0_28 = arith.constant 0 : index
    %49 = vector.load %arg5[%c0_26, %c2, %c0_27, %c0_28] : memref<1x5x8x128xf32, #tpu.memory_space<vmem>>, vector<1x1x8x128xf32>
    %50 = vector.shape_cast %49 : vector<1x1x8x128xf32> to vector<8x128xf32>
    %51 = arith.addf %50, %32 : vector<8x128xf32>
    %c0_29 = arith.constant 0 : index
    %c2_30 = arith.constant 2 : index
    %c0_31 = arith.constant 0 : index
    %c0_32 = arith.constant 0 : index
    %52 = vector.load %arg5[%c0_29, %c2_30, %c0_31, %c0_32] : memref<1x5x8x128xf32, #tpu.memory_space<vmem>>, vector<1x1x8x128xf32>
    %53 = vector.shape_cast %52 : vector<1x1x8x128xf32> to vector<8x128xf32>
    %54 = vector.shape_cast %51 : vector<8x128xf32> to vector<1x1x8x128xf32>
    tpu.vector_store %arg5[%c0_29, %c2_30, %c0_31, %c0_32], %54 {strides = array<i32>} : memref<1x5x8x128xf32, #tpu.memory_space<vmem>>, vector<1x1x8x128xf32>,
    %c0_33 = arith.constant 0 : index
    %c3 = arith.constant 3 : index
    %c0_34 = arith.constant 0 : index
    %c0_35 = arith.constant 0 : index
    %55 = vector.load %arg5[%c0_33, %c3, %c0_34, %c0_35] : memref<1x5x8x128xf32, #tpu.memory_space<vmem>>, vector<1x1x8x128xf32>
    %56 = vector.shape_cast %55 : vector<1x1x8x128xf32> to vector<8x128xf32>
    %57 = arith.addf %56, %34 : vector<8x128xf32>
    %c0_36 = arith.constant 0 : index
    %c3_37 = arith.constant 3 : index
    %c0_38 = arith.constant 0 : index
    %c0_39 = arith.constant 0 : index
    %58 = vector.load %arg5[%c0_36, %c3_37, %c0_38, %c0_39] : memref<1x5x8x128xf32, #tpu.memory_space<vmem>>, vector<1x1x8x128xf32>
    %59 = vector.shape_cast %58 : vector<1x1x8x128xf32> to vector<8x128xf32>
    %60 = vector.shape_cast %57 : vector<8x128xf32> to vector<1x1x8x128xf32>
    tpu.vector_store %arg5[%c0_36, %c3_37, %c0_38, %c0_39], %60 {strides = array<i32>} : memref<1x5x8x128xf32, #tpu.memory_space<vmem>>, vector<1x1x8x128xf32>,
    %c0_40 = arith.constant 0 : index
    %c4 = arith.constant 4 : index
    %c0_41 = arith.constant 0 : index
    %c0_42 = arith.constant 0 : index
    %61 = vector.load %arg5[%c0_40, %c4, %c0_41, %c0_42] : memref<1x5x8x128xf32, #tpu.memory_space<vmem>>, vector<1x1x8x128xf32>
    %62 = vector.shape_cast %61 : vector<1x1x8x128xf32> to vector<8x128xf32>
    %63 = arith.addf %62, %36 : vector<8x128xf32>
    %c0_43 = arith.constant 0 : index
    %c4_44 = arith.constant 4 : index
    %c0_45 = arith.constant 0 : index
    %c0_46 = arith.constant 0 : index
    %64 = vector.load %arg5[%c0_43, %c4_44, %c0_45, %c0_46] : memref<1x5x8x128xf32, #tpu.memory_space<vmem>>, vector<1x1x8x128xf32>
    %65 = vector.shape_cast %64 : vector<1x1x8x128xf32> to vector<8x128xf32>
    %66 = vector.shape_cast %63 : vector<8x128xf32> to vector<1x1x8x128xf32>
    tpu.vector_store %arg5[%c0_43, %c4_44, %c0_45, %c0_46], %66 {strides = array<i32>} : memref<1x5x8x128xf32, #tpu.memory_space<vmem>>, vector<1x1x8x128xf32>,
    return
  }
  func.func @transform_0(%arg0: i32, %arg1: i32, %arg2: memref<2xf32, #tpu.memory_space<smem>>) -> (i32, i32) {
    %c1_i32 = arith.constant 1 : i32
    %0 = arith.muli %arg0, %c1_i32 : i32
    %1 = arith.addi %0, %arg1 : i32
    %c0_i32 = arith.constant 0 : i32
    %2 = arith.minsi %1, %c0_i32 : i32
    %c0_i32_0 = arith.constant 0 : i32
    %c0_i32_1 = arith.constant 0 : i32
    return %2, %c0_i32_0 : i32, i32
  }
  func.func @transform_1(%arg0: i32, %arg1: i32, %arg2: memref<2xf32, #tpu.memory_space<smem>>) -> (i32, i32) {
    %c1_i32 = arith.constant 1 : i32
    %0 = arith.muli %arg0, %c1_i32 : i32
    %1 = arith.addi %0, %arg1 : i32
    %c0_i32 = arith.constant 0 : i32
    %2 = arith.minsi %1, %c0_i32 : i32
    %c0_i32_0 = arith.constant 0 : i32
    %c0_i32_1 = arith.constant 0 : i32
    return %2, %c0_i32_0 : i32, i32
  }
  func.func @transform_2(%arg0: i32, %arg1: i32, %arg2: memref<2xf32, #tpu.memory_space<smem>>) -> (i32, i32, i32, i32) {
    %c0_i32 = arith.constant 0 : i32
    %c0_i32_0 = arith.constant 0 : i32
    %c0_i32_1 = arith.constant 0 : i32
    %c0_i32_2 = arith.constant 0 : i32
    return %arg0, %c0_i32, %c0_i32_0, %c0_i32_1 : i32, i32, i32, i32
  }
}

</mosaic_0001>

<bundles_post_ra>
// kernel: tpu_custom_call.1
= control target key start
LH: loop header
LB: loop body
LE: loop exit
PB: predicated region body
PF: predicated region fallthrough
CT: control target
= control target key end

     0   :  { %s957_s0 = inlined_call_operand.hbm [shape: f32[2], index: 0, kind: input, shape index: {}]   ;;  %s958_s1 = inlined_call_operand.hbm [shape: f32[8,128], index: 1, kind: input, shape index: {}]   ;;  %s959_s2 = inlined_call_operand.hbm [shape: f32[8,128], index: 2, kind: input, shape index: {}]   ;;  %s960_s3 = inlined_call_operand.hbm [shape: f32[2,5,8,128], index: 3, kind: output, shape index: {}]  }
   0x1   :  { %s529_s14 = scalar_lea.hbm %s957_s0, 16 }
   0x2   :  { %p530_p0 = scmp.ne.s32.totalorder %s957_s0, %s529_s14  ;;  %p533_p1 = scmp.lt.u32.totalorder %s529_s14, %s957_s0 }
   0x4   :  { %p535_p2 = pnand %p533_p1, %p530_p0 }
   0x6   :  { %538 = shalt.err (!%p535_p2)  }
   0x7   :  { %s710_s19 = smov [#allocation3]  }
   0x8   :  { %9 = dma.hbm_to_smem %s957_s0, 16, %s710_s19, [#allocation2] }
   0x9   :  { %663 = dma.done.wait [#allocation2], 16 }
   0xa   :  { %664 = vsyncadd [#allocation2], 4294967280 }
   0xb   :  { %11 = sfence }
   0xc   :  { %12 = vsyncpa [#allocation5], 0 }
   0xd   :  { %14 = vsyncpa [#allocation5 + $0x1], 0 }
   0xe   :  { %15 = vsyncpa [#allocation8], 0 }
   0xf   :  { %17 = vsyncpa [#allocation8 + $0x1], 0 }
  0x10   :  { %18 = vsyncpa [#allocation6], 0 }
  0x11   :  { %20 = vsyncpa [#allocation6 + $0x1], 0  ;;  %s748_s22 = smov 0   ;;  %s750_s23 = smov 0  }
  0x12   :  { %s752_s24 = smov 0   ;;  %s754_s25 = smov 0  }
  0x13   :  { %s756_s26 = smov 0   ;;  %s758_s0 = smov 0  }
  0x14   :  { %s760_s27 = smov 0   ;;  %s762_s28 = smov 0  }
  0x15 LB: > { %s408_s29 = sadd.s32 4294967295, %s708_s28   ;;  %s409_s30 = sadd.s32 4294967294, %s708_s28   ;;  %s708_s28 = sphi %s762_s28, %s26_s28   ;;  %s704_s27 = sphi %s760_s27, %s981_s27   ;;  %s700_s0 = sphi %s758_s0, %s980_s0   ;;  %s696_s26 = sphi %s756_s26, %s947_s26   ;;  %s692_s25 = sphi %s754_s25, %s979_s25   ;;  %s688_s24 = sphi %s752_s24, %s978_s24   ;;  %s684_s23 = sphi %s750_s23, %s977_s23   ;;  %s680_s22 = sphi %s748_s22, %s976_s22  }
  0x16   : > { %s38_s4 = sadd.s32 1, %s704_s27  ;;  %p677_p4 = scmp.ne.s32.totalorder %s696_s26, 0 }
  0x17   : > { %p40_p3 = scmp.ge.s32.totalorder %s38_s4, 2  ;;  %p59_p5 = scmp.eq.s32.totalorder %s708_s28, 0 }
  0x18   : > { %p64_p6 = scmp.ne.s32.totalorder %s696_s26, %s692_s25  ;;  %p65_p8 = scmp.eq.s32.totalorder %s408_s29, 0 }
  0x19   : > { %s983_s4 = smov (%p40_p3, %s38_s4), 0  ;;  %p794_p7 = por %p677_p4, %p59_p5 }
  0x1a   : > { %p798_p9 = por %p65_p8, %p64_p6  ;;  %s106_s7 = ssub.s32 %s704_s27, %s983_s4 }
  0x1b   : > { %p107_p10 = scmp.eq.s32.totalorder %s106_s7, 0  ;;  %s109_s8 = sadd.s32 1, %s688_s24 }
  0x1c   : > { %s964_s6 = scalar_select %p798_p9, 1, 0 }
  0x1d   : > { %s806_s9 = scalar_select %p107_p10, %s688_s24, %s109_s8  }
  0x1e   : > { %p119_p11 = scmp.ne.s32.totalorder %s688_s24, %s684_s23  ;;  %p120_p12 = scmp.eq.s32.totalorder %s408_s29, 1 }
  0x1f   : > { %p125_p13 = scmp.ne.s32.totalorder %s684_s23, %s680_s22  ;;  %p126_p0 = scmp.eq.s32.totalorder %s409_s30, 1 }
  0x20   : > { %p812_p1 = por %p120_p12, %p119_p11  ;;  %p451_p4 = scmp.lt.s32.totalorder %s708_s28, 2 }
  0x21   : > { %p817_p3 = por %p126_p0, %p125_p13  ;;  %s711_s12 = smov [#allocation4]  }
  0x22   : > { %s965_s10 = scalar_select %p812_p1, 1, 0 }
  0x23   : > { %s966_s11 = scalar_select %p817_p3, 1, 0 }
  0x24   : > { %s160_s13 = sshll.u32 %s711_s12, 4  ;;  %p824_p5 = pnand %p451_p4, %p794_p7  ;;  %s161_s13 = int_to_ptr.vmem [resolvable:$true] %s160_s13 }
  0x25   : > { %s539_s17 = scalar_lea.hbm %s958_s1, 128 }
  0x26   : > { %p540_p10 = scmp.ne.s32.totalorder %s958_s1, %s539_s17  ;;  %p541_p11 = pneg %p824_p5 }
  0x27   : > { %p546_p13 = scmp.lt.u32.totalorder %s539_s17, %s539_s17  ;;  %p548_p0 = scmp.lt.u32.totalorder %s539_s17, %s958_s1 }
  0x28   : > { %p542_p7 = pnand %p541_p11, %p540_p10 }
  0x29   : > { %p549_p4 = por %p548_p0, %p546_p13 }
  0x2a   : > { %p543_p12 = pneg %p542_p7 }
  0x2c   : > { %p550_p2 = pnand %p549_p4, %p543_p12 }
  0x2e   : > { %553 = shalt.err (!%p550_p2)
}
  0x2f   : > { %s554_s25 = scalar_lea.vmem %s161_s13, 128  ;;  %s561_s29 = scalar_lea.vmem %s161_s13, 256 }
  0x30   : > { %p555_p6 = scmp.ne.s32.totalorder %s161_s13, %s554_s25  ;;  %p562_p1 = scmp.lt.s32.totalorder %s161_s13, %s161_s13 }
  0x31   : > { %p563_p9 = scmp.lt.s32.totalorder %s561_s29, %s554_s25 }
  0x32   : > { %p557_p8 = pnand %p555_p6, %p541_p11 }
  0x33   : > { %p564_p10 = por %p563_p9, %p562_p1 }
  0x34   : > { %p558_p3 = pneg %p557_p8 }
  0x36   : > { %p565_p7 = pnand %p564_p10, %p558_p3 }
  0x38   : > { %568 = shalt.err (!%p565_p7)
}
  0x39   : > { %443 = dma.hbm_to_vmem [thread:$0]  (!%p824_p5), %s958_s1, 128, %s161_s13, [#allocation5]  }
  0x3a   : > { %p968_p2 = scmp.lt.s32.totalorder %s708_s28, 3  ;;  %p969_p12 = scmp.ge.s32.totalorder %s708_s28, 1 }
  0x3b   : > { %s712_s8 = smov [#allocation7]   ;;  %s569_s17 = scalar_lea.hbm %s959_s2, 128 }
  0x3c   : > { %p856_p13 = pnand %p969_p12, %p968_p2  ;;  %s181_s12 = sshll.u32 %s712_s8, 4  ;;  %s182_s12 = int_to_ptr.vmem [resolvable:$true] %s181_s12 }
  0x3d   : > { %p570_p9 = scmp.ne.s32.totalorder %s959_s2, %s569_s17  ;;  %p576_p6 = scmp.lt.u32.totalorder %s569_s17, %s569_s17 }
  0x3e   : > { %s970_s7 = scalar_select %p856_p13, 1, 0 }
  0x3f   : > { %p572_p1 = pnand %p570_p9, %p541_p11  ;;  %p578_p8 = scmp.lt.u32.totalorder %s569_s17, %s959_s2 }
  0x41   : > { %p573_p3 = pneg %p572_p1  ;;  %p579_p0 = por %p578_p8, %p576_p6 }
  0x43   : > { %p580_p4 = pnand %p579_p0, %p573_p3 }
  0x45   : > { %583 = shalt.err (!%p580_p4)
}
  0x46   : > { %s584_s21 = scalar_lea.vmem %s182_s12, 128  ;;  %s591_s25 = scalar_lea.vmem %s182_s12, 256 }
  0x47   : > { %p585_p10 = scmp.ne.s32.totalorder %s182_s12, %s584_s21  ;;  %p592_p12 = scmp.lt.s32.totalorder %s182_s12, %s182_s12 }
  0x48   : > { %p593_p13 = scmp.lt.s32.totalorder %s591_s25, %s584_s21 }
  0x49   : > { %p587_p7 = pnand %p585_p10, %p541_p11 }
  0x4a   : > { %p594_p9 = por %p593_p13, %p592_p12 }
  0x4b   : > { %p588_p2 = pneg %p587_p7 }
  0x4d   : > { %p595_p1 = pnand %p594_p9, %p588_p2 }
  0x4f   : > { %598 = shalt.err (!%p595_p1)
}
  0x50   : > { %446 = dma.hbm_to_vmem [thread:$0]  (!%p824_p5), %s959_s2, 128, %s182_s12, [#allocation8]  }
  0x51   : > { %p971_p3 = scmp.ne.s32.totalorder %s970_s7, 0 }
  0x52   : > { %s192_s5 = sand.u32 (!%p971_p3), 1, %s696_s26   ;;  %p972_p11 = scmp.ne.s32.totalorder (!%p971_p3), %s964_s6, 0 }
  0x53   : > { %190 = sbr.rel (%p971_p3) target bundleno = 122 (0x7a), region = 28  ;;  %s417_s8 = sshll.u32 (!%p971_p3), %s192_s5, 3 }
  0x54   : > { %s193_s15 = scalar_lea.sflag (!%p971_p3), [#allocation5], %s192_s5  ;;  %s196_s16 = scalar_lea.vmem (!%p971_p3), [#allocation4], %s417_s8 }
  0x5a   : > { %666 = dma.done.wait (%p972_p11), %s193_s15, 128  }
  0x5b   : > { %668 = vsyncadd (%p972_p11), %s193_s15, 4294967168  ;;  %s202_s14 = scalar_lea.sflag [#allocation8], %s192_s5  ;;  %s205_s17 = scalar_lea.vmem [#allocation7], %s417_s8 }
  0x5c   : > { %670 = dma.done.wait (%p972_p11), %s202_s14, 128  }
  0x5d   : > { %672 = vsyncadd (%p972_p11), %s202_s14, 4294967168  ;;  %s228_s7 = sand.u32 1, %s684_s23   ;;  %s420_s12 = sshll.u32 %s700_s0, 3  ;;  %v253_v0 = vlaneseq  ;;  %v255_v4 = vld [vmem:[%s196_s16] sm:$0xff]  ;;  %v257_v5 = vld [vmem:[%s205_s17] sm:$0xff] }
  0x5e   : > { %s246_s18 = sld [smem:[#allocation3]]  ;;  %s252_s19 = ssub.s32 8, %s420_s12 }
  0x5f   : > { %s419_s13 = sld [smem:[#allocation3 + $0x1]]  ;;  %s432_s20 = smul.u32 40, %s228_s7  ;;  %v254_v1 = vshrl.u32 %v253_v0, 7  ;;  %v259_v2 = vstv %s252_s19 }
  0x60   : > { %s433_s6 = smul.u32 640, %s700_s0  ;;  %s905_s0 = scalar_lea.sflag [#allocation6], %s228_s7 }
  0x61   : > { %vm260_vm0 = vcmp.lt.s32.totalorder %v254_v1, %v259_v2  ;;  %s230_s21 = scalar_lea.vmem [#allocation9], %s432_s20  ;;  %p973_p13 = scmp.ne.s32.totalorder %s965_s10, 0 }
  0x62   : > { %s304_s25 = sshll.u32 %s230_s21, 4  ;;  %s901_s5 = scalar_lea.hbm %s960_s3, %s433_s6  ;;  %s896_s25 = int_to_ptr.vmem [resolvable:$true] %s304_s25 }
  0x63   : > { %s599_s8 = scalar_lea.vmem %s896_s25, 640  ;;  %s713_s15 = smov [#allocation9]  }
  0x64   : > { %v247_v3 = vstv %s246_s18  ;;  %p600_p5 = scmp.ne.s32.totalorder %s896_s25, %s599_s8  ;;  %s603_s16 = sshll.u32 %s713_s15, 4  ;;  %s604_s16 = int_to_ptr.vmem [resolvable:$false] %s603_s16 }
  0x65   : > { %v256_v6 = vsub.f32 %v255_v4, %v247_v3  ;;  %v249_v7 = vstv %s419_s13  ;;  %s605_s14 = scalar_lea.vmem %s604_s16, 1280  ;;  %p606_p0 = scmp.lt.s32.totalorder %s896_s25, %s604_s16 }
  0x66   : > { %v258_v8 = vsub.f32 %v257_v5, %v249_v7  ;;  %p601_p6 = pnand %p600_p5, %p973_p13  ;;  %p607_p4 = scmp.lt.s32.totalorder %s605_s14, %s599_s8 }
  0x67   : > { %v261_v9 = vsel %vm260_vm0, %v256_v6, 0.0 }
  0x68   : > { %v262_v10 = vsel %vm260_vm0, %v258_v8, 0.0  ;;  %v265_v11 = vmul.f32 %v261_v9, %v261_v9  ;;  %273 = vst [vmem:[%s230_s21] sm:$0xff] %v261_v9  ;;  %p602_p8 = pneg %p601_p6  ;;  %p608_p10 = por %p607_p4, %p606_p0 }
  0x69   : > { %v267_v12 = vmul.f32 %v262_v10, %v262_v10  ;;  %v269_v13 = vmul.f32 %v262_v10, %v261_v9  ;;  %422 = vst [vmem:[%s230_s21 + $0x8] sm:$0xff] %v262_v10 }
  0x6a   : > { %424 = vst [vmem:[%s230_s21 + $0x10] sm:$0xff] %v265_v11  ;;  %p609_p7 = pnand %p608_p10, %p602_p8 }
  0x6b   : > { %426 = vst [vmem:[%s230_s21 + $0x18] sm:$0xff] %v267_v12  ;;  %428 = vst [vmem:[%s230_s21 + $0x20] sm:$0xff] %v269_v13 }
  0x6c   : > { %612 = shalt.err (!%p609_p7)
}
  0x6d   : > { %s613_s17 = scalar_lea.hbm %s901_s5, 640  ;;  %s617_s18 = scalar_lea.hbm %s960_s3, 1280 }
  0x6e   : > { %p614_p2 = scmp.ne.s32.totalorder %s901_s5, %s613_s17  ;;  %p618_p1 = scmp.lt.u32.totalorder %s901_s5, %s960_s3 }
  0x6f   : > { %p619_p3 = scmp.lt.u32.totalorder %s617_s18, %s613_s17  ;;  %p621_p5 = scmp.lt.u32.totalorder %s613_s17, %s901_s5 }
  0x70   : > { %p615_p12 = pnand %p614_p2, %p973_p13 }
  0x71   : > { %p620_p11 = por %p619_p3, %p618_p1 }
  0x72   : > { %p616_p9 = pneg %p615_p12 }
  0x73   : > { %p622_p6 = por %p621_p5, %p620_p11 }
  0x75   : > { %p623_p8 = pnand %p622_p6, %p616_p9 }
  0x77   : > { %626 = shalt.err (!%p623_p8)
}
  0x78   : > { %s714_s20 = smov 128   ;;  %s715_s6 = smov 8  }
  0x79   : > { %438 = dma.vmem_to_hbm [thread:$0]  (%p973_p13), %s896_s25, 640, %s901_s5, %s905_s0, %s714_s20, %s714_s20, %s715_s6  }
  0x7a PF: > { %s319_s21 = sand.u32 1, %s680_s22   ;;  %p974_p0 = scmp.ne.s32.totalorder %s966_s11, 0 }
  0x7b   : > { %p975_p4 = scmp.ge.s32.totalorder %s708_s28, 2  ;;  %s320_s29 = scalar_lea.sflag [#allocation6], %s319_s21 }
  0x7d   : > { %p448_p10 = pnand %p975_p4, %p974_p0 }
  0x7f   : > { %674 = dma.done.wait (!%p448_p10), %s320_s29, 640  }
  0x80   : > { %676 = vsyncadd (!%p448_p10), %s320_s29, 4294966656  ;;  %s26_s28 = sadd.s32 1, %s708_s28   ;;  %s976_s22 = smov %s684_s23 }
  0x81   : > { %p23_p7 = scmp.ge.s32.totalorder %s26_s28, 4   ;;  %s977_s23 = smov %s688_s24 }
  0x82   : > { %s978_s24 = smov %s806_s9  ;;  %s979_s25 = smov %s696_s26 }
  0x83   : > { %s947_s26 = smov 0   ;;  %s980_s0 = smov %s704_s27 }
  0x84   : > { %s981_s27 = smov %s983_s4  ;;  %25 = sbr.rel (!%p23_p7) target bundleno = 21 (0x15), region = 94 }
  0x8b   :  { %325 = vsyncpa [#allocation5], 1 }
  0x8c   :  { %327 = vsyncpa [#allocation5 + $0x1], 1 }
  0x8d   :  { %328 = vsyncpa [#allocation8], 1 }
  0x8e   :  { %330 = vsyncpa [#allocation8 + $0x1], 1 }
  0x8f   :  { %331 = vsyncpa [#allocation6], 1 }
  0x90   :  { %333 = vsyncpa [#allocation6 + $0x1], 1 }

</bundles_post_ra>
